<compile_context>
chip_gen: v7x
topology: tpu7x:2x2x1
jax: 0.10.0
libtpu: 0.0.40
codegen_flags: <defaults>
</compile_context>

<pallas_src>
import functools

import numpy as np
import jax
import jax.numpy as jnp
from jax import lax
from jax.experimental import pallas as pl
from jax.experimental.pallas import tpu as pltpu

_LANES = 128
# tanh(half_sigma * (PAD - center)) == -1.0 exactly in f32, i.e. padded pixels
# contribute exactly 0 to every sigmoid-sum bin after the wrapper's affine.
_PAD_VALUE = -1e9


def _grad_hist_kernel(x_ref, c_ref, o_ref, acc_ref, *,
                      half_sigma, trows, unroll, use_bf16_tanh):
    """Grid = (B, bins // BC, rows // trows).

    x_ref  : (1, trows, 128) f32  pixel tile, pixels lane-resident
    c_ref  : (BC, 128)       f32  bin centers * (sigma/2), lane-broadcast
    o_ref  : (1, BC, 1)      f32  sum-of-tanh for this (batch, bin-chunk)
    acc_ref: (BC, 128)       f32  per-lane partial sums, lives across the
                                  innermost (pixel) grid axis
    """
    k = pl.program_id(2)

    @pl.when(k == 0)
    def _():
        acc_ref[...] = jnp.zeros_like(acc_ref)

    c = c_ref[...]                                        # (BC, 128)

    def body(i, t):
        # (1, 128) row of pixels; sigma/2 applied once per 128 pixels.
        xs = x_ref[0, pl.ds(i, 1), :] * half_sigma
        arg = xs - c                                      # sublane broadcast
        if use_bf16_tanh:
            # v6e/v7x: EUP bf16 tanh ~2x f32 rate; accumulate in f32.
            th = jnp.tanh(arg.astype(jnp.bfloat16)).astype(jnp.float32)
        else:
            th = jnp.tanh(arg)
        return t + th                                     # (BC, 128)

    acc_ref[...] = lax.fori_loop(0, trows, body, acc_ref[...], unroll=unroll)

    @pl.when(k == pl.num_programs(2) - 1)
    def _():
        # one tiny cross-lane reduce per (batch, bin-chunk)
        o_ref[0, :, :] = acc_ref[...].sum(axis=1, keepdims=True)


def grad_hist(x, bins=512, value_range=(-256, 256), sigma=5,
              pixels_per_step=65536, bin_chunk=64, use_bf16_tanh=False):
    assert value_range[1] > value_range[0]
    assert bins % bin_chunk == 0 and bin_chunk % 8 == 0
    B, C = x.shape[0], x.shape[1]
    assert C == 1, "_GradHist semantics only hold for single-channel input"
    n_true = int(np.prod(x.shape[2:]))

    # Bin centers, pre-scaled by sigma/2 (tanh form of sigmoid) and
    # pre-broadcast across the 128 lanes: layout cost paid once, in the wrapper.
    delta = float(value_range[1] - value_range[0]) / float(bins)
    centers = (float(value_range[0])
               + delta * (jnp.arange(bins, dtype=jnp.float32) + 0.5))
    half_sigma = 0.5 * float(sigma)
    c_bcast = jnp.broadcast_to((half_sigma * centers)[:, None], (bins, _LANES))

    # Flatten pixels and pad up to whole (trows x 128) tiles with a value
    # whose tanh is exactly -1 (zero contribution to every bin).
    xf = x.reshape(B, n_true).astype(jnp.float32)
    rows_needed = -(-n_true // _LANES)
    max_trows = max(1, pixels_per_step // _LANES)
    if rows_needed <= max_trows:
        trows = rows_needed                       # block == full dim: always legal
    else:
        trows = max(8, (max_trows // 8) * 8)      # multiple of 8 for (8,128) tiling
    rows_padded = -(-rows_needed // trows) * trows
    n_padded = rows_padded * _LANES
    if n_padded != n_true:
        xf = jnp.pad(xf, ((0, 0), (0, n_padded - n_true)),
                     constant_values=_PAD_VALUE)
    xr = xf.reshape(B, rows_padded, _LANES)

    n_bin_chunks = bins // bin_chunk
    grid = (B, n_bin_chunks, rows_padded // trows)

    # Full unroll for tiny tiles; partial unroll (enough to cover the EUP FIFO
    # latency) once the row loop gets long, to avoid code bloat / vreg spills.
    unroll = True if trows < 64 else 8

    kernel = functools.partial(_grad_hist_kernel,
                               half_sigma=half_sigma, trows=trows,
                               unroll=unroll, use_bf16_tanh=use_bf16_tanh)

    t = pl.pallas_call(
        kernel,
        out_shape=jax.ShapeDtypeStruct((B, bins, 1), jnp.float32),
        grid_spec=pltpu.PrefetchScalarGridSpec(
            num_scalar_prefetch=0,
            grid=grid,
            in_specs=[
                pl.BlockSpec((1, trows, _LANES), lambda b, j, k: (b, k, 0)),
                pl.BlockSpec((bin_chunk, _LANES), lambda b, j, k: (j, 0)),
            ],
            out_specs=pl.BlockSpec((1, bin_chunk, 1), lambda b, j, k: (b, j, 0)),
            scratch_shapes=[pltpu.VMEM((bin_chunk, _LANES), jnp.float32)],
        ),
        compiler_params=pltpu.CompilerParams(
            dimension_semantics=("parallel", "parallel", "arbitrary")),
    )(xr, c_bcast)[:, :, 0]                               # (B, bins) sum of tanh

    # Finalize (O(B*bins), negligible next to the N*bins EUP work in-kernel):
    #   s[b,k]   = 0.5 * t[b,k] + 0.5 * N_padded   (pad pixels cancel exactly)
    #   out[b,0] = N_true - s[b,0];  out[b,k] = s[b,k-1] - s[b,k]
    # NOTE: f32 accumulation; for images approaching 2^24 pixels the counts
    # lose integer precision (inherent to the f32 formulation of the module).
    s = 0.5 * t + 0.5 * jnp.float32(n_padded)
    first = jnp.float32(n_true) - s[:, :1]
    rest = s[:, :-1] - s[:, 1:]
    return jnp.concatenate([first, rest], axis=1)


def grad_hist_ref(x, bins=512, value_range=(-256, 256), sigma=5):
    """Pure-JAX transcription of the PyTorch forward (for verification)."""
    B = x.shape[0]
    N = int(np.prod(x.shape[2:]))
    delta = float(value_range[1] - value_range[0]) / float(bins)
    centers = (float(value_range[0])
               + delta * (jnp.arange(bins, dtype=jnp.float32) + 0.5))
    xf = x.reshape(B, -1)[:, None, :] - centers[:, None]       # (B, bins, N)
    s = jax.nn.sigmoid(xf * sigma)
    ones = jnp.ones((B, 1, N), jnp.float32)
    zeros = jnp.zeros((B, 1, N), jnp.float32)
    diff = jnp.concatenate([ones, s], axis=1) - jnp.concatenate([s, zeros], axis=1)
    return diff.sum(axis=-1)[:, :-1]


if __name__ == "__main__":
    key = jax.random.PRNGKey(0)
    # (B, C, H, W) = (2, 1, 16, 16); values span a good chunk of (-256, 256).
    x = jax.random.normal(key, (2, 1, 16, 16), dtype=jnp.float32) * 64.0

    out = jax.block_until_ready(grad_hist(x))
    ref = grad_hist_ref(x)
    np.testing.assert_allclose(np.asarray(out), np.asarray(ref),
                               rtol=1e-4, atol=2e-3)
    assert out.shape == (2, 512) and out.dtype == jnp.float32

    # Second case exercises the pixel-padding path (N = 100, not a multiple of 128).
    x2 = jax.random.normal(jax.random.PRNGKey(1), (1, 1, 10, 10),
                           dtype=jnp.float32) * 64.0
    out2 = jax.block_until_ready(grad_hist(x2))
    ref2 = grad_hist_ref(x2)
    np.testing.assert_allclose(np.asarray(out2), np.asarray(ref2),
                               rtol=1e-4, atol=2e-3)

    # Third case exercises the multi-step pixel axis (accumulator carried across
    # the innermost grid axis), the partial-unroll path, and row padding:
    # N = 9216 pixels, forced small pixels_per_step -> several pixel steps.
    x3 = jax.random.normal(jax.random.PRNGKey(2), (1, 1, 96, 96),
                           dtype=jnp.float32) * 64.0
    out3 = jax.block_until_ready(grad_hist(x3, pixels_per_step=2048))
    ref3 = grad_hist_ref(x3)
    np.testing.assert_allclose(np.asarray(out3), np.asarray(ref3),
                               rtol=1e-4, atol=2e-2)

    print("KERNEL_OK")
</pallas_src>

<mosaic_0001>
module attributes {stable_mosaic.version = 11 : i64} {
  func.func @_grad_hist_kernel(%arg0: i32, %arg1: i32, %arg2: i32, %arg3: memref<1x2x128xf32, #tpu.memory_space<vmem>>, %arg4: memref<64x128xf32, #tpu.memory_space<vmem>>, %arg5: memref<1x64x1xf32, #tpu.memory_space<vmem>>, %arg6: memref<64x128xf32, #tpu.memory_space<vmem>>) attributes {dimension_semantics = [#tpu.dimension_semantics<parallel>, #tpu.dimension_semantics<parallel>, #tpu.dimension_semantics<arbitrary>], iteration_bounds = array<i64: 2, 8, 1>, scalar_prefetch = 0 : i64, scratch_operands = 1 : i64, tpu.core_type = #tpu.core_type<tc>, window_params = [{transform_indices = @transform_0, window_bounds = array<i64: 1, 2, 128>}, {transform_indices = @transform_1, window_bounds = array<i64: 64, 128>}, {transform_indices = @transform_2, window_bounds = array<i64: 1, 64, 1>}]} {
    %c0_i32 = arith.constant 0 : i32
    %0 = arith.cmpi eq, %arg2, %c0_i32 : i32
    %1 = arith.extui %0 : i1 to i32
    %c0_i32_0 = arith.constant 0 : i32
    %2 = arith.cmpi ne, %1, %c0_i32_0 : i32
    scf.if %2 {
      %cst_14 = arith.constant 0.000000e+00 : f32
      %27 = vector.broadcast %cst_14 : f32 to vector<64x128xf32>
      %c0_15 = arith.constant 0 : index
      %c0_16 = arith.constant 0 : index
      %28 = vector.load %arg6[%c0_15, %c0_16] : memref<64x128xf32, #tpu.memory_space<vmem>>, vector<64x128xf32>
      tpu.vector_store %arg6[%c0_15, %c0_16], %27 {strides = array<i32>} : memref<64x128xf32, #tpu.memory_space<vmem>>, vector<64x128xf32>,
    } else {
    }
    %c0 = arith.constant 0 : index
    %c0_1 = arith.constant 0 : index
    %3 = vector.load %arg4[%c0, %c0_1] : memref<64x128xf32, #tpu.memory_space<vmem>>, vector<64x128xf32>
    %c0_2 = arith.constant 0 : index
    %c0_3 = arith.constant 0 : index
    %4 = vector.load %arg6[%c0_2, %c0_3] : memref<64x128xf32, #tpu.memory_space<vmem>>, vector<64x128xf32>
    %c0_i32_4 = arith.constant 0 : i32
    %c0_5 = arith.constant 0 : index
    %5 = arith.index_cast %c0_i32_4 : i32 to index
    %c0_6 = arith.constant 0 : index
    %6 = vector.load %arg3[%c0_5, %5, %c0_6] : memref<1x2x128xf32, #tpu.memory_space<vmem>>, vector<1x1x128xf32>
    %7 = vector.shape_cast %6 : vector<1x1x128xf32> to vector<1x128xf32>
    %cst = arith.constant 2.500000e+00 : f32
    %8 = vector.broadcast %cst : f32 to vector<1x128xf32>
    %9 = arith.mulf %7, %8 : vector<1x128xf32>
    %10 = vector.broadcast %9 : vector<1x128xf32> to vector<64x128xf32>
    %11 = arith.subf %10, %3 : vector<64x128xf32>
    %12 = math.tanh %11 : vector<64x128xf32>
    %13 = arith.addf %4, %12 : vector<64x128xf32>
    %c1_i32 = arith.constant 1 : i32
    %c0_7 = arith.constant 0 : index
    %14 = arith.index_cast %c1_i32 : i32 to index
    %c0_8 = arith.constant 0 : index
    %15 = vector.load %arg3[%c0_7, %14, %c0_8] : memref<1x2x128xf32, #tpu.memory_space<vmem>>, vector<1x1x128xf32>
    %16 = vector.shape_cast %15 : vector<1x1x128xf32> to vector<1x128xf32>
    %cst_9 = arith.constant 2.500000e+00 : f32
    %17 = vector.broadcast %cst_9 : f32 to vector<1x128xf32>
    %18 = arith.mulf %16, %17 : vector<1x128xf32>
    %19 = vector.broadcast %18 : vector<1x128xf32> to vector<64x128xf32>
    %20 = arith.subf %19, %3 : vector<64x128xf32>
    %21 = math.tanh %20 : vector<64x128xf32>
    %22 = arith.addf %13, %21 : vector<64x128xf32>
    %c2_i32 = arith.constant 2 : i32
    %c0_10 = arith.constant 0 : index
    %c0_11 = arith.constant 0 : index
    %23 = vector.load %arg6[%c0_10, %c0_11] : memref<64x128xf32, #tpu.memory_space<vmem>>, vector<64x128xf32>
    tpu.vector_store %arg6[%c0_10, %c0_11], %22 {strides = array<i32>} : memref<64x128xf32, #tpu.memory_space<vmem>>, vector<64x128xf32>,
    %c0_i32_12 = arith.constant 0 : i32
    %24 = arith.cmpi eq, %arg2, %c0_i32_12 : i32
    %25 = arith.extui %24 : i1 to i32
    %c0_i32_13 = arith.constant 0 : i32
    %26 = arith.cmpi ne, %25, %c0_i32_13 : i32
    scf.if %26 {
      %c0_14 = arith.constant 0 : index
      %c0_15 = arith.constant 0 : index
      %27 = vector.load %arg6[%c0_14, %c0_15] : memref<64x128xf32, #tpu.memory_space<vmem>>, vector<64x128xf32>
      %cst_16 = arith.constant dense<0.000000e+00> : vector<64xf32>
      %28 = vector.multi_reduction <add>, %27, %cst_16 [1] : vector<64x128xf32> to vector<64xf32>
      %29 = vector.shape_cast %28 : vector<64xf32> to vector<64x1xf32>
      %c0_17 = arith.constant 0 : index
      %c0_18 = arith.constant 0 : index
      %c0_19 = arith.constant 0 : index
      %30 = vector.load %arg5[%c0_17, %c0_18, %c0_19] : memref<1x64x1xf32, #tpu.memory_space<vmem>>, vector<1x64x1xf32>
      %31 = vector.shape_cast %30 : vector<1x64x1xf32> to vector<64x1xf32>
      %32 = vector.shape_cast %29 : vector<64x1xf32> to vector<1x64x1xf32>
      tpu.vector_store %arg5[%c0_17, %c0_18, %c0_19], %32 {strides = array<i32>} : memref<1x64x1xf32, #tpu.memory_space<vmem>>, vector<1x64x1xf32>,
    } else {
    }
    return
  }
  func.func @transform_0(%arg0: i32, %arg1: i32, %arg2: i32) -> (i32, i32, i32) {
    %c0_i32 = arith.constant 0 : i32
    %c0_i32_0 = arith.constant 0 : i32
    return %arg0, %arg2, %c0_i32 : i32, i32, i32
  }
  func.func @transform_1(%arg0: i32, %arg1: i32, %arg2: i32) -> (i32, i32) {
    %c0_i32 = arith.constant 0 : i32
    %c0_i32_0 = arith.constant 0 : i32
    return %arg1, %c0_i32 : i32, i32
  }
  func.func @transform_2(%arg0: i32, %arg1: i32, %arg2: i32) -> (i32, i32, i32) {
    %c0_i32 = arith.constant 0 : i32
    %c0_i32_0 = arith.constant 0 : i32
    return %arg0, %arg1, %c0_i32 : i32, i32, i32
  }
}

</mosaic_0001>

<bundles_post_ra>
// kernel: tpu_custom_call.1
= control target key start
LH: loop header
LB: loop body
LE: loop exit
PB: predicated region body
PF: predicated region fallthrough
CT: control target
= control target key end

     0   :  { %7 = vsyncpa [#allocation4], 0  ;;  %s1077_s0 = inlined_call_operand.hbm [shape: f32[2,2,128], index: 0, kind: input, shape index: {}]   ;;  %s1078_s1 = inlined_call_operand.hbm [shape: f32[512,128], index: 1, kind: input, shape index: {}]   ;;  %s1079_s2 = inlined_call_operand.vmem [shape: f32[2,512,1], index: 2, kind: output, shape index: {}]  }
   0x1   :  { %9 = vsyncpa [#allocation4 + $0x1], 0 }
   0x2   :  { %10 = vsyncpa [#allocation6], 0 }
   0x3   :  { %12 = vsyncpa [#allocation6 + $0x1], 0  ;;  %s816_s9 = smov 0   ;;  %s818_s10 = smov 0  }
   0x4   :  { %s820_s11 = smov 0   ;;  %s822_s12 = smov 0  }
   0x5   :  { %s824_s13 = smov 0   ;;  %s826_s14 = smov 0  }
   0x6   :  { %s828_s15 = smov 0   ;;  %s830_s16 = smov 0  }
   0x7   :  { %s832_s17 = smov 0   ;;  %s834_s18 = smov 0  }
   0x8   :  { %s836_s19 = smov 0  }
   0x9 LB: > { %s489_s20 = sadd.s32 4294967295, %s795_s19   ;;  %s37_s21 = sadd.s32 1, %s791_s18  ;;  %s795_s19 = sphi %s836_s19, %s18_s19   ;;  %s791_s18 = sphi %s834_s18, %s1104_s18   ;;  %s787_s17 = sphi %s832_s17, %s1103_s17   ;;  %s783_s16 = sphi %s830_s16, %s1102_s16   ;;  %s779_s15 = sphi %s828_s15, %s1101_s15   ;;  %s775_s14 = sphi %s826_s14, %s1100_s14   ;;  %s771_s13 = sphi %s824_s13, %s1099_s13   ;;  %s767_s12 = sphi %s822_s12, %s1098_s12   ;;  %s763_s11 = sphi %s820_s11, %s1097_s11   ;;  %s759_s10 = sphi %s818_s10, %s1096_s10   ;;  %s755_s9 = sphi %s816_s9, %s1095_s9  }
   0xa   : > { %p53_p0 = scmp.ne.s32.totalorder %s775_s14, %s771_s13  ;;  %p54_p1 = scmp.eq.s32.totalorder %s795_s19, 0 }
   0xb   : > { %p59_p2 = scmp.ne.s32.totalorder %s771_s13, %s767_s12  ;;  %p60_p3 = scmp.eq.s32.totalorder %s489_s20, 0 }
   0xc   : > { %p79_p4 = scmp.ne.s32.totalorder %s763_s11, %s759_s10  ;;  %p876_p5 = por %p54_p1, %p53_p0 }
   0xd   : > { %p85_p6 = scmp.ne.s32.totalorder %s759_s10, %s755_s9  ;;  %p881_p7 = por %p60_p3, %p59_p2 }
   0xe   : > { %p81_p8 = por %p79_p4, %p54_p1  ;;  %p518_p10 = scmp.lt.s32.totalorder %s795_s19, 16 }
   0xf   : > { %s1083_s24 = scalar_select %p881_p7, 1, 0 }
  0x10   : > { %p885_p9 = por %p85_p6, %p60_p3  ;;  %s137_s26 = sand.u32 1, %s775_s14  }
  0x11   : > { %s493_s27 = sshll.u32 %s137_s26, 1  ;;  %s494_s28 = sshll.u32 %s791_s18, 5 }
  0x12   : > { %s1084_s25 = scalar_select %p885_p9, 1, 0 }
  0x13   : > { %s895_s3 = scalar_lea.hbm %s1077_s0, %s494_s28  ;;  %s141_s4 = scalar_lea.vmem [#allocation3], %s493_s27 }
  0x14   : > { %s149_s5 = sshll.u32 %s141_s4, 4  ;;  %p901_p11 = pnand %p518_p10, %p876_p5  ;;  %s897_s5 = int_to_ptr.vmem [resolvable:$true] %s149_s5 }
  0x15   : > { %p905_p12 = pnand %p518_p10, %p81_p8  ;;  %s138_s8 = scalar_lea.sflag [#allocation4], %s137_s26 }
  0x16   : > { %s641_s9 = scalar_lea.hbm %s895_s3, 32  ;;  %p643_p2 = pneg %p901_p11 }
  0x17   : > { %p642_p1 = scmp.ne.s32.totalorder %s895_s3, %s641_s9  ;;  %s646_s23 = scalar_lea.hbm %s1077_s0, 64 }
  0x18   : > { %p647_p5 = scmp.lt.u32.totalorder %s895_s3, %s1077_s0  ;;  %p648_p6 = scmp.lt.u32.totalorder %s646_s23, %s641_s9 }
  0x19   : > { %p644_p3 = pnand %p643_p2, %p642_p1  ;;  %p650_p10 = scmp.lt.u32.totalorder %s641_s9, %s895_s3 }
  0x1a   : > { %p649_p8 = por %p648_p6, %p647_p5 }
  0x1b   : > { %p645_p4 = pneg %p644_p3 }
  0x1c   : > { %p651_p13 = por %p650_p10, %p649_p8 }
  0x1e   : > { %p652_p0 = pnand %p651_p13, %p645_p4 }
  0x20   : > { %655 = shalt.err (!%p652_p0)
}
  0x21   : > { %s656_s26 = scalar_lea.vmem %s897_s5, 32  ;;  %s797_s29 = smov [#allocation3]  }
  0x22   : > { %p657_p1 = scmp.ne.s32.totalorder %s897_s5, %s656_s26  ;;  %s661_s30 = sshll.u32 %s797_s29, 4  ;;  %s662_s30 = int_to_ptr.vmem [resolvable:$false] %s661_s30 }
  0x23   : > { %s663_s4 = scalar_lea.vmem %s662_s30, 64  ;;  %p664_p7 = scmp.lt.s32.totalorder %s897_s5, %s662_s30 }
  0x24   : > { %p659_p3 = pnand %p657_p1, %p643_p2  ;;  %p665_p5 = scmp.lt.s32.totalorder %s663_s4, %s656_s26 }
  0x26   : > { %p660_p9 = pneg %p659_p3  ;;  %p666_p6 = por %p665_p5, %p664_p7 }
  0x28   : > { %p667_p8 = pnand %p666_p6, %p660_p9 }
  0x2a   : > { %670 = shalt.err (!%p667_p8)
}
  0x2b   : > { %514 = dma.hbm_to_vmem [thread:$0]  (!%p901_p11), %s895_s3, 32, %s897_s5, %s138_s8  }
  0x2c   : > { %p1087_p13 = scmp.lt.s32.totalorder %s795_s19, 17  ;;  %p1088_p0 = scmp.ge.s32.totalorder %s795_s19, 1 }
  0x2d   : > { %s72_s6 = sadd.s32 1, %s763_s11  ;;  %s156_s12 = sand.u32 1, %s763_s11  }
  0x2e   : > { %p940_p2 = pnand %p1088_p0, %p1087_p13  ;;  %s33_s20 = sadd.s32 1, %s787_s17 }
  0x2f   : > { %p35_p7 = scmp.ge.s32.totalorder %s33_s20, 8  ;;  %s495_s23 = sshll.u32 %s156_s12, 6 }
  0x30   : > { %s1089_s9 = scalar_select %p940_p2, 1, 0 }
  0x31   : > { %s506_s27 = sshll.u32 %s787_s17, 10  ;;  %s1106_s20 = smov (%p35_p7, %s33_s20), 0 }
  0x32   : > { %s1108_s21 = smov (!%p35_p7, %s37_s21), %s791_s18  ;;  %s69_s3 = ssub.s32 %s787_s17, %s1106_s20 }
  0x33   : > { %s958_s28 = scalar_lea.hbm %s1078_s1, %s506_s27  ;;  %p39_p9 = scmp.ge.s32.totalorder %s1108_s21, 2 }
  0x34   : > { %p70_p11 = scmp.eq.s32.totalorder %s69_s3, 0  ;;  %s160_s26 = scalar_lea.vmem [#allocation5], %s495_s23 }
  0x35   : > { %s167_s29 = sshll.u32 %s160_s26, 4  ;;  %s1110_s21 = smov (%p39_p9, %s1108_s21), 0  ;;  %s967_s29 = int_to_ptr.vmem [resolvable:$true] %s167_s29 }
  0x36   : > { %s963_s30 = scalar_select %p70_p11, %s763_s11, %s72_s6  }
  0x37   : > { %s41_s4 = ssub.s32 %s791_s18, %s1110_s21  ;;  %s973_s27 = scalar_lea.sflag [#allocation6], %s156_s12 }
  0x38   : > { %p969_p4 = scmp.eq.s32.totalorder %s41_s4, 0  ;;  %s671_s8 = scalar_lea.hbm %s958_s28, 1024 }
  0x39   : > { %p672_p10 = scmp.ne.s32.totalorder %s958_s28, %s671_s8  ;;  %p673_p1 = pneg %p905_p12 }
  0x3a   : > { %s676_s3 = scalar_lea.hbm %s1078_s1, 8192  ;;  %p677_p6 = scmp.lt.u32.totalorder %s958_s28, %s1078_s1 }
  0x3b   : > { %p674_p3 = pnand %p673_p1, %p672_p10  ;;  %p678_p8 = scmp.lt.u32.totalorder %s676_s3, %s671_s8 }
  0x3c   : > { %p680_p0 = scmp.lt.u32.totalorder %s671_s8, %s958_s28 }
  0x3d   : > { %p675_p5 = pneg %p674_p3  ;;  %p679_p13 = por %p678_p8, %p677_p6 }
  0x3f   : > { %p681_p7 = por %p680_p0, %p679_p13 }
  0x41   : > { %p682_p9 = pnand %p681_p7, %p675_p5 }
  0x43   : > { %685 = shalt.err (!%p682_p9)
}
  0x44   : > { %s686_s12 = scalar_lea.vmem %s967_s29, 1024  ;;  %s798_s4 = smov [#allocation5]  }
  0x45   : > { %p687_p11 = scmp.ne.s32.totalorder %s967_s29, %s686_s12  ;;  %s691_s23 = sshll.u32 %s798_s4, 4  ;;  %s692_s23 = int_to_ptr.vmem [resolvable:$false] %s691_s23 }
  0x46   : > { %s693_s22 = scalar_lea.vmem %s692_s23, 2048  ;;  %p694_p2 = scmp.lt.s32.totalorder %s967_s29, %s692_s23 }
  0x47   : > { %p689_p10 = pnand %p687_p11, %p673_p1  ;;  %p695_p6 = scmp.lt.s32.totalorder %s693_s22, %s686_s12 }
  0x49   : > { %p690_p3 = pneg %p689_p10  ;;  %p696_p8 = por %p695_p6, %p694_p2 }
  0x4b   : > { %p697_p13 = pnand %p696_p8, %p690_p3 }
  0x4d   : > { %700 = shalt.err (!%p697_p13)
}
  0x4e   : > { %s799_s8 = smov 128   ;;  %s800_s6 = smov 8  }
  0x4f   : > { %517 = dma.hbm_to_vmem [thread:$0]  (!%p905_p12), %s958_s28, 1024, %s967_s29, %s973_s27, %s799_s8, %s799_s8, %s800_s6  }
  0x50   : > { %s1091_s3 = sadd.s32 1, %s775_s14  ;;  %p1092_p1 = scmp.ne.s32.totalorder %s1089_s9, 0 }
  0x51   : > { %s1006_s26 = scalar_select %p969_p4, %s775_s14, %s1091_s3  }
  0x52   : > { %179 = sbr.rel (%p1092_p1) target bundleno = 275 (0x113), region = 28  ;;  %s181_s12 = sand.u32 (!%p1092_p1), 1, %s771_s13  }
  0x53   : > { %s499_s4 = sshll.u32 (!%p1092_p1), %s181_s12, 1  ;;  %s182_s23 = scalar_lea.sflag (!%p1092_p1), [#allocation4], %s181_s12 }
  0x54   : > { %s185_s22 = scalar_lea.vmem (!%p1092_p1), [#allocation3], %s499_s4  ;;  %p1093_p2 = scmp.ne.s32.totalorder (!%p1092_p1), %s1083_s24, 0 }
  0x59   : > { %746 = dma.done.wait (%p1093_p2), %s182_s23, 32  }
  0x5a   : > { %748 = vsyncadd (%p1093_p2), %s182_s23, 4294967264  ;;  %s190_s7 = sand.u32 1, %s759_s10   ;;  %p1094_p12 = scmp.ne.s32.totalorder %s1084_s25, 0 }
  0x5b   : > { %s500_s28 = sshll.u32 %s190_s7, 6  ;;  %s191_s29 = scalar_lea.sflag [#allocation6], %s190_s7 }
  0x5c   : > { %s1016_s5 = scalar_lea.vmem [#allocation5], %s500_s28 }
  0x5d   : > { %750 = dma.done.wait (%p1094_p12), %s191_s29, 1024  }
  0x5e   : > { %752 = vsyncadd (%p1094_p12), %s191_s29, 4294966272  ;;  %v265_v0 = vlaneseq  ;;  %v263_v3 = vld [vmem:[%s185_s22] sm:$0x1]  ;;  %v293_v4 = vld [vmem:[%s185_s22 + $0x1] sm:$0x1]  ;;  %s501_s24 = sshll.u32 %s779_s15, 3 }
  0x5f   : > { %v264_v5 = vmul.f32 2.5, %v263_v3  ;;  %v294_v6 = vmul.f32 2.5, %v293_v4  ;;  %v249_v7 = vld [vmem:[%s1016_s5 + $0x10] sm:$0xff]  ;;  %v247_v8 = vld [vmem:[%s1016_s5] sm:$0xff]  ;;  %v250_v11 = vld [vmem:[%s1016_s5 + $0x18] sm:$0xff]  ;;  %p226_p4 = scmp.lt.s32.totalorder %s783_s16, 1 }
  0x60   : > { %v266_v1 = vshrl.u32 %v265_v0, 7  ;;  %v248_v16 = vld [vmem:[%s1016_s5 + $0x8] sm:$0xff]  ;;  %v251_v22 = vld [vmem:[%s1016_s5 + $0x20] sm:$0xff]  ;;  %v254_v25 = vld [vmem:[%s1016_s5 + $0x38] sm:$0xff]  ;;  %p228_p5 = scmp.lt.s32.totalorder %s501_s24, 63  ;;  %vm358_vm0 = vcmask 7168  }
  0x61   : > { %v252_v19 = vld [vmem:[%s1016_s5 + $0x28] sm:$0xff]  ;;  %v253_v28 = vld [vmem:[%s1016_s5 + $0x30] sm:$0xff]  ;;  %s1112_s16 = smov (!%p226_p4, %s783_s16), 1 }
  0x62   : > { %v267_v2 = vsub.s32 0, %v266_v1  ;;  %s1114_s24 = smov (!%p228_p5, %s501_s24), 63  ;;  %s502_s25 = sshll.u32 %s1112_s16, 6 }
  0x63   : > { %s231_s9 = sadd.s32 %s502_s25, %s1114_s24 }
  0x64   : > { %v268_v9 = vrot.slane %v264_v5, %v267_v2  ;;  %v298_v10 = vrot.slane %v294_v6, %v267_v2  ;;  %s503_s27 = sshll.u32 %s231_s9, 3 }
  0x65   : > { %s233_s3 = scalar_lea.vmem %s1079_s2, %s503_s27 }
  0x66   : > { %v271_v12 = vsub.f32 %v268_v9, %v249_v7  ;;  %v301_v13 = vsub.f32 %v298_v10, %v249_v7  ;;  %v269_v14 = vsub.f32 %v268_v9, %v247_v8  ;;  %v299_v15 = vsub.f32 %v298_v10, %v247_v8 }
  0x67   : > { %v272_v17 = vsub.f32 %v268_v9, %v250_v11  ;;  %v302_v18 = vsub.f32 %v298_v10, %v250_v11  ;;  %v270_v20 = vsub.f32 %v268_v9, %v248_v16  ;;  %v300_v21 = vsub.f32 %v298_v10, %v248_v16 }
  0x68   : > { %609 = vtanh.f32 %v271_v12  ;;  %v274_v23 = vsub.f32 %v268_v9, %v252_v19  ;;  %v304_v24 = vsub.f32 %v298_v10, %v252_v19  ;;  %v273_v26 = vsub.f32 %v268_v9, %v251_v22 }
  0x69   : > { %611 = vtanh.f32 %v301_v13  ;;  %v303_v27 = vsub.f32 %v298_v10, %v251_v22  ;;  %v276_v29 = vsub.f32 %v268_v9, %v254_v25  ;;  %v306_v30 = vsub.f32 %v298_v10, %v254_v25 }
  0x6a   : > { %613 = vtanh.f32 %v269_v14  ;;  %v275_v32 = vsub.f32 %v268_v9, %v253_v28  ;;  %v305_v34 = vsub.f32 %v298_v10, %v253_v28 }
  0x6b   : > { %615 = vtanh.f32 %v299_v15 }
  0x6c   : > { %617 = vtanh.f32 %v272_v17 }
  0x6d   : > { %619 = vtanh.f32 %v302_v18 }
  0x6e   : > { %621 = vtanh.f32 %v270_v20 }
  0x6f   : > { %623 = vtanh.f32 %v300_v21 }
  0x70   : > { %625 = vtanh.f32 %v274_v23 }
  0x71   : > { %627 = vtanh.f32 %v304_v24 }
  0x72   : > { %v610_v31 = vpop.eup %609  ;;  %629 = vtanh.f32 %v273_v26 }
  0x73   : > { %v612_v33 = vpop.eup %611  ;;  %631 = vtanh.f32 %v303_v27 }
  0x74   : > { %v614_v35 = vpop.eup %613  ;;  %v317_v36 = vadd.f32 %v612_v33, %v610_v31  ;;  %633 = vtanh.f32 %v276_v29 }
  0x75   : > { %v616_v37 = vpop.eup %615  ;;  %635 = vtanh.f32 %v306_v30 }
  0x76   : > { %v618_v38 = vpop.eup %617  ;;  %346 = vadd.xlane.f32.xlu1 %v317_v36  ;;  %v315_v39 = vadd.f32 %v616_v37, %v614_v35  ;;  %637 = vtanh.f32 %v275_v32 }
  0x77   : > { %v620_v40 = vpop.eup %619  ;;  %639 = vtanh.f32 %v305_v34 }
  0x78   : > { %v622_v41 = vpop.eup %621  ;;  %342 = vadd.xlane.f32.xlu0 %v315_v39  ;;  %v318_v42 = vadd.f32 %v620_v40, %v618_v38 }
  0x79   : > { %v624_v43 = vpop.eup %623 }
  0x7a   : > { %v626_v44 = vpop.eup %625  ;;  %348 = vadd.xlane.f32.xlu1 %v318_v42  ;;  %v316_v45 = vadd.f32 %v624_v43, %v622_v41 }
  0x7b   : > { %v628_v46 = vpop.eup %627 }
  0x7c   : > { %v630_v47 = vpop.eup %629  ;;  %344 = vadd.xlane.f32.xlu0 %v316_v45  ;;  %v320_v48 = vadd.f32 %v628_v46, %v626_v44 }
  0x7d   : > { %v632_v49 = vpop.eup %631 }
  0x7e   : > { %v634_v50 = vpop.eup %633  ;;  %352 = vadd.xlane.f32.xlu1 %v320_v48  ;;  %v319_v51 = vadd.f32 %v632_v49, %v630_v47 }
  0x7f   : > { %v636_v52 = vpop.eup %635 }
  0x80   : > { %v638_v53 = vpop.eup %637  ;;  %350 = vadd.xlane.f32.xlu0 %v319_v51  ;;  %v322_v54 = vadd.f32 %v636_v52, %v634_v50 }
  0x81   : > { %v640_v55 = vpop.eup %639 }
  0x82   : > { %356 = vadd.xlane.f32.xlu1 %v322_v54  ;;  %v321_v56 = vadd.f32 %v640_v55, %v638_v53 }
  0x84   : > { %354 = vadd.xlane.f32.xlu0 %v321_v56 }
 0x103   : > { %v347_v57 = vpop.xlane.xlu1 %346 }
 0x104   : > { %361 = vst.msk [vmem:[%s233_s3 + $0x10] sm:$0xff] %vm358_vm0, %v347_v57 }
 0x105   : > { %v343_v58 = vpop.xlane.xlu0 %342 }
 0x106   : > { %359 = vst.msk [vmem:[%s233_s3] sm:$0xff] %vm358_vm0, %v343_v58 }
 0x107   : > { %v349_v59 = vpop.xlane.xlu1 %348 }
 0x108   : > { %362 = vst.msk [vmem:[%s233_s3 + $0x18] sm:$0xff] %vm358_vm0, %v349_v59 }
 0x109   : > { %v345_v60 = vpop.xlane.xlu0 %344 }
 0x10a   : > { %360 = vst.msk [vmem:[%s233_s3 + $0x8] sm:$0xff] %vm358_vm0, %v345_v60 }
 0x10b   : > { %v353_v61 = vpop.xlane.xlu1 %352 }
 0x10c   : > { %364 = vst.msk [vmem:[%s233_s3 + $0x28] sm:$0xff] %vm358_vm0, %v353_v61 }
 0x10d   : > { %v351_v62 = vpop.xlane.xlu0 %350 }
 0x10e   : > { %363 = vst.msk [vmem:[%s233_s3 + $0x20] sm:$0xff] %vm358_vm0, %v351_v62 }
 0x10f   : > { %v357_v63 = vpop.xlane.xlu1 %356 }
 0x110   : > { %366 = vst.msk [vmem:[%s233_s3 + $0x38] sm:$0xff] %vm358_vm0, %v357_v63 }
 0x111   : > { %v355_v0 = vpop.xlane.xlu0 %354 }
 0x112   : > { %365 = vst.msk [vmem:[%s233_s3 + $0x30] sm:$0xff] %vm358_vm0, %v355_v0 }
 0x113 PF: > { %s18_s19 = sadd.s32 1, %s795_s19   ;;  %s1095_s9 = smov %s759_s10 }
 0x114   : > { %p15_p0 = scmp.ge.s32.totalorder %s18_s19, 18   ;;  %s1096_s10 = smov %s763_s11 }
 0x115   : > { %s1097_s11 = smov %s963_s30  ;;  %s1098_s12 = smov %s771_s13 }
 0x116   : > { %s1099_s13 = smov %s775_s14  ;;  %s1100_s14 = smov %s1006_s26 }
 0x117   : > { %s1101_s15 = smov %s787_s17  ;;  %s1102_s16 = smov %s791_s18 }
 0x118   : > { %s1103_s17 = smov %s1106_s20  ;;  %s1104_s18 = smov %s1110_s21 }
 0x119   :  { %17 = sbr.rel (!%p15_p0) target bundleno = 9 (0x9), region = 89 }
 0x120   :  { %397 = vsyncpa [#allocation4], 1 }
 0x121   :  { %399 = vsyncpa [#allocation4 + $0x1], 1 }
 0x122   :  { %400 = vsyncpa [#allocation6], 1 }
 0x123   :  { %402 = vsyncpa [#allocation6 + $0x1], 1 }

</bundles_post_ra>
